<compile_context>
chip_gen: v5e
topology: v5e:2x2
jax: 0.10.0
libtpu: 0.0.40
codegen_flags: <defaults>
</compile_context>

<pallas_src>
import functools

import jax
import jax.numpy as jnp
from jax.experimental import pallas as pl
from jax.experimental.pallas import tpu as pltpu


# ----------------------------------------------------------------------------
# Pallas kernel: fused 3x3 conv (single K=9*Cpad matmul) + bias + ReLU
# ----------------------------------------------------------------------------
def _conv3x3_relu_kernel(x_ref, w_ref, b_ref, o_ref, xpad_ref, *,
                         H, W, Cin, tb, lead):
    # x_ref   : (tb, Cin, H*W) f32  raw input rows for this grid step
    # w_ref   : (Cout, 9*Cpad) f32  tap-major (tap = dy*3 + dx), channel-padded
    # b_ref   : (Cout, 1)      f32
    # o_ref   : (tb, Cout, H*W) f32 lane-dense output tile
    # xpad_ref: (Cpad, L)      f32  scratch: zero-padded, flattened input row
    HW = H * W
    Cpad, L = xpad_ref.shape
    base = lead - (W + 1)          # tap (dy,dx) slice starts at base + dy*W + dx

    # Zero the padded-row scratch.  Done EVERY step (not just step 0) so the
    # kernel stays correct when the "parallel" batch axis is split across
    # v7x's two TensorCores (each core owns its own scratch instance).
    xpad_ref[...] = jnp.zeros_like(xpad_ref)

    # Horizontal-edge masks in padded-flat ("u") coordinates, built once per
    # grid step:  dx==0 taps read wrap-around garbage where u % W == 0,
    #             dx==2 taps read wrap-around garbage where u % W == 1.
    q = jax.lax.broadcasted_iota(jnp.int32, (1, L), 1)
    off = (-base) % W                      # q + off == u (mod W), stays >= 0
    if W & (W - 1) == 0:
        uw = (q + off) & (W - 1)
    else:
        uw = (q + off) % W
    keep_l = uw != 0                       # keep-mask for dx == 0 taps
    keep_r = uw != 1                       # keep-mask for dx == 2 taps

    cols = []
    for i in range(tb):
        # Copy this sub-batch into the aligned data window (rows [0:Cin],
        # lanes [lead : lead+HW]); padding rows/lanes stay zero.
        xpad_ref[0:Cin, lead:lead + HW] = x_ref[i]
        xp = xpad_ref[...]                            # (Cpad, L) f32
        xl = jnp.where(keep_l, xp, 0.0)               # masked copy for dx == 0
        xr = jnp.where(keep_r, xp, 0.0)               # masked copy for dx == 2

        taps = []
        for dy in range(3):
            for dx in range(3):
                src = xl if dx == 0 else (xr if dx == 2 else xp)
                s = base + dy * W + dx                # static flat offset
                taps.append(src[:, s:s + HW])         # (Cpad, HW)
        # 8-sublane pieces -> vreg-aligned concatenation along K.
        cols.append(jnp.concatenate(taps, axis=0))    # (9*Cpad, HW)

    xk = cols[0] if tb == 1 else jnp.concatenate(cols, axis=1)  # (K, tb*HW)

    # One MXU contraction for all 9 taps (and all tb sub-batches), f32 acc.
    y = jnp.dot(w_ref[...], xk, preferred_element_type=jnp.float32)
    # TODO(synk): bias could be folded into the contraction as a ones-row /
    # bias-column, but this single (Cout, tb*HW) add is negligible.
    y = jnp.maximum(y + b_ref[...], 0.0)

    for i in range(tb):
        o_ref[i] = y[:, i * HW:(i + 1) * HW].astype(o_ref.dtype)


def _pick_block_batch(B, min_steps=2):
    """Largest tb dividing B that still leaves >= min_steps grid steps, so the
    'parallel' batch axis keeps both v7x TensorCores busy (harmless on
    v5e/v6e, which are single-core and simply get fewer, fatter steps)."""
    if B < min_steps:
        return max(B, 1)
    for tb in range(B // min_steps, 0, -1):
        if B % tb == 0:
            return tb
    return 1


# ----------------------------------------------------------------------------
# Inner module: Conv2d(Cin, Cout, 3, padding=1) + ReLU   (NCHW in / NCHW out)
# ----------------------------------------------------------------------------
def conv3x3_relu(x_nchw, weight, bias):
    """x: [B, Cin, H, W] f32; weight: [Cout, Cin, 3, 3]; bias: [Cout]."""
    B, Cin, H, W = x_nchw.shape
    Cout = weight.shape[0]
    HW = H * W
    # Lane-dense unmasked stores require H*W to be a multiple of 128.
    assert HW % 128 == 0, "H*W must be a multiple of 128"

    Cpad = ((Cin + 7) // 8) * 8                 # pad channels to sublane width
    lead = ((W + 1 + 127) // 128) * 128         # aligned start of the data window
    L = lead + HW + W + 1                       # covers the last tap slice

    tb = _pick_block_batch(B)
    grid = (B // tb,)

    # Metadata-only view of x (contiguous NCHW -> [B, Cin, HW]); no HBM prep.
    xf = x_nchw.reshape(B, Cin, HW).astype(jnp.float32)

    # Weights -> (Cout, 9*Cpad): K ordered (tap, channel) with tap = dy*3 + dx
    # and channels zero-padded to Cpad, matching the in-kernel tap stacking.
    # Tiny one-time transform; constant-folded under jit.
    wt = jnp.transpose(weight, (0, 2, 3, 1))                       # (Cout,3,3,Cin)
    wt = jnp.pad(wt, ((0, 0), (0, 0), (0, 0), (0, Cpad - Cin)))
    wk = wt.reshape(Cout, 9 * Cpad).astype(jnp.float32)
    b2 = bias.reshape(Cout, 1).astype(jnp.float32)

    kernel = functools.partial(_conv3x3_relu_kernel,
                               H=H, W=W, Cin=Cin, tb=tb, lead=lead)

    out_flat = pl.pallas_call(
        kernel,
        out_shape=jax.ShapeDtypeStruct((B, Cout, HW), jnp.float32),
        grid_spec=pltpu.PrefetchScalarGridSpec(
            num_scalar_prefetch=0,
            grid=grid,
            in_specs=[
                pl.BlockSpec((tb, Cin, HW), lambda g: (g, 0, 0)),
                pl.BlockSpec((Cout, 9 * Cpad), lambda g: (0, 0)),
                pl.BlockSpec((Cout, 1), lambda g: (0, 0)),
            ],
            out_specs=pl.BlockSpec((tb, Cout, HW), lambda g: (g, 0, 0)),
            scratch_shapes=[pltpu.VMEM((Cpad, L), jnp.float32)],
        ),
        compiler_params=pltpu.CompilerParams(
            dimension_semantics=("parallel",),
        ),
    )(xf, wk, b2)

    # [B, Cout, H*W] is already contiguous NCHW; reshape is metadata-only.
    return out_flat.reshape(B, Cout, H, W)


# ----------------------------------------------------------------------------
# depth_wrapper equivalent
# ----------------------------------------------------------------------------
def make_depth_wrapper(module_fn):
    """Returns f(*args) -> (module_fn(*args), 0), exactly like depth_wrapper."""
    def forward(*args):
        return (module_fn(*args), 0)
    return forward


if __name__ == "__main__":
    key = jax.random.PRNGKey(0)
    B, Cin, H, W, Cout = 2, 4, 16, 16, 8

    kx, kw, kb = jax.random.split(key, 3)
    x = jax.random.normal(kx, (B, Cin, H, W), dtype=jnp.float32)
    weight = 0.1 * jax.random.normal(kw, (Cout, Cin, 3, 3), dtype=jnp.float32)
    bias = 0.01 * jax.random.normal(kb, (Cout,), dtype=jnp.float32)

    inner_module = jax.jit(
        functools.partial(conv3x3_relu, weight=weight, bias=bias))
    wrapped = make_depth_wrapper(inner_module)

    out, flag = wrapped(x)
    out = jax.block_until_ready(out)
    assert out.shape == (B, Cout, H, W)
    assert flag == 0

    # Exact-f32 reference.  The kernel is now f32 end-to-end (previously bf16,
    # 3e-2 tolerance); the remaining slack only covers MXU f32 pass rounding.
    ref = jax.lax.conv_general_dilated(
        x, weight, window_strides=(1, 1), padding=((1, 1), (1, 1)),
        dimension_numbers=("NCHW", "OIHW", "NCHW"),
        precision=jax.lax.Precision.HIGHEST)
    ref = jnp.maximum(ref + bias.reshape(1, Cout, 1, 1), 0.0)
    err = float(jnp.max(jnp.abs(out - ref)))
    assert jnp.allclose(out, ref, rtol=1e-2, atol=1e-2), err

    print("KERNEL_OK")
</pallas_src>

<mosaic_0001>
module attributes {stable_mosaic.version = 11 : i64} {
  func.func @_conv3x3_relu_kernel(%arg0: i32, %arg1: memref<1x4x256xf32, #tpu.memory_space<vmem>>, %arg2: memref<8x72xf32, #tpu.memory_space<vmem>>, %arg3: memref<8x1xf32, #tpu.memory_space<vmem>>, %arg4: memref<1x8x256xf32, #tpu.memory_space<vmem>>, %arg5: memref<8x401xf32, #tpu.memory_space<vmem>>) attributes {dimension_semantics = [#tpu.dimension_semantics<parallel>], iteration_bounds = array<i64: 2>, scalar_prefetch = 0 : i64, scratch_operands = 1 : i64, tpu.core_type = #tpu.core_type<tc>, window_params = [{transform_indices = @transform_0, window_bounds = array<i64: 1, 4, 256>}, {pipeline_mode = #tpu.pipeline_mode<synchronous>, transform_indices = @transform_1, window_bounds = array<i64: 8, 72>}, {pipeline_mode = #tpu.pipeline_mode<synchronous>, transform_indices = @transform_2, window_bounds = array<i64: 8, 1>}, {transform_indices = @transform_3, window_bounds = array<i64: 1, 8, 256>}]} {
    %cst = arith.constant 0.000000e+00 : f32
    %0 = vector.broadcast %cst : f32 to vector<8x401xf32>
    %c0 = arith.constant 0 : index
    %c0_0 = arith.constant 0 : index
    %1 = vector.load %arg5[%c0, %c0_0] : memref<8x401xf32, #tpu.memory_space<vmem>>, vector<8x401xf32>
    tpu.vector_store %arg5[%c0, %c0_0], %0 {strides = array<i32>} : memref<8x401xf32, #tpu.memory_space<vmem>>, vector<8x401xf32>,
    %2 = tpu.iota {dimensions = array<i32: 1>} : vector<1x401xi32>
    %c1_i32 = arith.constant 1 : i32
    %3 = vector.broadcast %c1_i32 : i32 to vector<1x401xi32>
    %4 = arith.addi %2, %3 : vector<1x401xi32>
    %c15_i32 = arith.constant 15 : i32
    %5 = vector.broadcast %c15_i32 : i32 to vector<1x401xi32>
    %6 = arith.andi %4, %5 : vector<1x401xi32>
    %c0_i32 = arith.constant 0 : i32
    %7 = vector.broadcast %c0_i32 : i32 to vector<1x401xi32>
    %8 = arith.cmpi ne, %6, %7 : vector<1x401xi32>
    %c1_i32_1 = arith.constant 1 : i32
    %9 = vector.broadcast %c1_i32_1 : i32 to vector<1x401xi32>
    %10 = arith.cmpi ne, %6, %9 : vector<1x401xi32>
    %c0_2 = arith.constant 0 : index
    %c0_3 = arith.constant 0 : index
    %c0_4 = arith.constant 0 : index
    %11 = vector.load %arg1[%c0_2, %c0_3, %c0_4] : memref<1x4x256xf32, #tpu.memory_space<vmem>>, vector<1x4x256xf32>
    %12 = vector.shape_cast %11 : vector<1x4x256xf32> to vector<4x256xf32>
    %c0_5 = arith.constant 0 : index
    %c128 = arith.constant 128 : index
    %13 = vector.load %arg5[%c0_5, %c128] : memref<8x401xf32, #tpu.memory_space<vmem>>, vector<4x256xf32>
    tpu.vector_store %arg5[%c0_5, %c128], %12 {strides = array<i32>} : memref<8x401xf32, #tpu.memory_space<vmem>>, vector<4x256xf32>,
    %c0_6 = arith.constant 0 : index
    %c0_7 = arith.constant 0 : index
    %14 = vector.load %arg5[%c0_6, %c0_7] : memref<8x401xf32, #tpu.memory_space<vmem>>, vector<8x401xf32>
    %cst_8 = arith.constant 0.000000e+00 : f32
    %15 = vector.shape_cast %8 : vector<1x401xi1> to vector<1x401xi1>
    %16 = vector.broadcast %15 : vector<1x401xi1> to vector<8x401xi1>
    %17 = vector.broadcast %cst_8 : f32 to vector<8x401xf32>
    %18 = arith.select %16, %14, %17 : vector<8x401xi1>, vector<8x401xf32>
    %cst_9 = arith.constant 0.000000e+00 : f32
    %19 = vector.shape_cast %10 : vector<1x401xi1> to vector<1x401xi1>
    %20 = vector.broadcast %19 : vector<1x401xi1> to vector<8x401xi1>
    %21 = vector.broadcast %cst_9 : f32 to vector<8x401xf32>
    %22 = arith.select %20, %14, %21 : vector<8x401xi1>, vector<8x401xf32>
    %23 = vector.extract_strided_slice %18 {offsets = [0, 111], sizes = [8, 256], strides = [1, 1]} : vector<8x401xf32> to vector<8x256xf32>
    %24 = vector.extract_strided_slice %14 {offsets = [0, 112], sizes = [8, 256], strides = [1, 1]} : vector<8x401xf32> to vector<8x256xf32>
    %25 = vector.extract_strided_slice %22 {offsets = [0, 113], sizes = [8, 256], strides = [1, 1]} : vector<8x401xf32> to vector<8x256xf32>
    %26 = vector.extract_strided_slice %18 {offsets = [0, 127], sizes = [8, 256], strides = [1, 1]} : vector<8x401xf32> to vector<8x256xf32>
    %27 = vector.extract_strided_slice %14 {offsets = [0, 128], sizes = [8, 256], strides = [1, 1]} : vector<8x401xf32> to vector<8x256xf32>
    %28 = vector.extract_strided_slice %22 {offsets = [0, 129], sizes = [8, 256], strides = [1, 1]} : vector<8x401xf32> to vector<8x256xf32>
    %29 = vector.extract_strided_slice %18 {offsets = [0, 143], sizes = [8, 256], strides = [1, 1]} : vector<8x401xf32> to vector<8x256xf32>
    %30 = vector.extract_strided_slice %14 {offsets = [0, 144], sizes = [8, 256], strides = [1, 1]} : vector<8x401xf32> to vector<8x256xf32>
    %31 = vector.extract_strided_slice %22 {offsets = [0, 145], sizes = [8, 256], strides = [1, 1]} : vector<8x401xf32> to vector<8x256xf32>
    %32 = tpu.concatenate %23, %24, %25, %26, %27, %28, %29, %30, %31 in 0 : vector<8x256xf32>, vector<8x256xf32>, vector<8x256xf32>, vector<8x256xf32>, vector<8x256xf32>, vector<8x256xf32>, vector<8x256xf32>, vector<8x256xf32>, vector<8x256xf32> -> vector<72x256xf32>
    %c0_10 = arith.constant 0 : index
    %c0_11 = arith.constant 0 : index
    %33 = vector.load %arg2[%c0_10, %c0_11] : memref<8x72xf32, #tpu.memory_space<vmem>>, vector<8x72xf32>
    %cst_12 = arith.constant dense<0.000000e+00> : vector<8x256xf32>
    %34 = tpu.matmul %33, %32, %cst_12 {dimension_numbers = #tpu.dot_dimension_numbers<[1], [0], [0], [1], [0, 0, 1, 1], [], []>} : vector<8x72xf32>, vector<72x256xf32>, vector<8x256xf32> -> vector<8x256xf32>
    %c0_13 = arith.constant 0 : index
    %c0_14 = arith.constant 0 : index
    %35 = vector.load %arg3[%c0_13, %c0_14] : memref<8x1xf32, #tpu.memory_space<vmem>>, vector<8x1xf32>
    %36 = vector.broadcast %35 : vector<8x1xf32> to vector<8x256xf32>
    %37 = arith.addf %34, %36 : vector<8x256xf32>
    %cst_15 = arith.constant 0.000000e+00 : f32
    %38 = vector.broadcast %cst_15 : f32 to vector<8x256xf32>
    %39 = arith.maximumf %37, %38 : vector<8x256xf32>
    %c0_16 = arith.constant 0 : index
    %c0_17 = arith.constant 0 : index
    %c0_18 = arith.constant 0 : index
    %40 = vector.load %arg4[%c0_16, %c0_17, %c0_18] : memref<1x8x256xf32, #tpu.memory_space<vmem>>, vector<1x8x256xf32>
    %41 = vector.shape_cast %40 : vector<1x8x256xf32> to vector<8x256xf32>
    %42 = vector.shape_cast %39 : vector<8x256xf32> to vector<1x8x256xf32>
    tpu.vector_store %arg4[%c0_16, %c0_17, %c0_18], %42 {strides = array<i32>} : memref<1x8x256xf32, #tpu.memory_space<vmem>>, vector<1x8x256xf32>,
    return
  }
  func.func @transform_0(%arg0: i32) -> (i32, i32, i32) {
    %c0_i32 = arith.constant 0 : i32
    %c0_i32_0 = arith.constant 0 : i32
    %c0_i32_1 = arith.constant 0 : i32
    return %arg0, %c0_i32, %c0_i32_0 : i32, i32, i32
  }
  func.func @transform_1(%arg0: i32) -> (i32, i32) {
    %c0_i32 = arith.constant 0 : i32
    %c0_i32_0 = arith.constant 0 : i32
    %c0_i32_1 = arith.constant 0 : i32
    return %c0_i32, %c0_i32_0 : i32, i32
  }
  func.func @transform_2(%arg0: i32) -> (i32, i32) {
    %c0_i32 = arith.constant 0 : i32
    %c0_i32_0 = arith.constant 0 : i32
    %c0_i32_1 = arith.constant 0 : i32
    return %c0_i32, %c0_i32_0 : i32, i32
  }
  func.func @transform_3(%arg0: i32) -> (i32, i32, i32) {
    %c0_i32 = arith.constant 0 : i32
    %c0_i32_0 = arith.constant 0 : i32
    %c0_i32_1 = arith.constant 0 : i32
    return %arg0, %c0_i32, %c0_i32_0 : i32, i32, i32
  }
}

</mosaic_0001>

<bundles_post_ra>
// kernel: conv3x3_relu.1
= control target key start
LH: loop header
LB: loop body
LE: loop exit
PB: predicated region body
PF: predicated region fallthrough
CT: control target
= control target key end

     0   :  { %s695_s12 = smov 0   ;;  %s787_s0 = inlined_call_operand.vmem [shape: f32[2,4,256], index: 0, kind: input, shape index: {}]   ;;  %s788_s1 = inlined_call_operand.vmem [shape: f32[8,72], index: 1, kind: input, shape index: {}]   ;;  %s789_s2 = inlined_call_operand.vmem [shape: f32[8,1], index: 2, kind: input, shape index: {}]   ;;  %s790_s3 = inlined_call_operand.vmem [shape: f32[2,8,256], index: 3, kind: output, shape index: {}]  }
   0x1 LB: > { %s515_s13 = sadd.s32 4294967295, %s662_s12   ;;  %p519_p0 = scmp.ge.s32.totalorder %s662_s12, 1  ;;  %s662_s12 = sphi %s695_s12, %s13_s12  }
   0x2   : > { %p137_p1 = scmp.lt.s32.totalorder %s662_s12, 3 }
   0x4   : > { %p138_p2 = pnand %p519_p0, %p137_p1 }
   0x5   : > { %p161_p3 = scmp.lt.s32.totalorder (!%p138_p2), %s515_s13, 1  ;;  %s665_s18 = smov (!%p138_p2), 95  }
   0x6   : > { %141 = sbr.rel (%p138_p2) target bundleno = 458 (0x1ca), region = 32  ;;  %s666_s19 = smov (!%p138_p2), 94  }
   0x7   : > { %s667_s20 = smov (!%p138_p2), 96   ;;  %s668_s21 = smov (!%p138_p2), 110  }
   0x8   : > { %s669_s22 = smov (!%p138_p2), 111   ;;  %s670_s23 = smov (!%p138_p2), 112  }
   0x9   : > { %s671_s24 = smov (!%p138_p2), 127   ;;  %s672_s25 = smov (!%p138_p2), 126  }
   0xa   : > { %s673_s26 = smov (!%p138_p2), 17  }
   0xb   : > { %vm174_vm0 = vcmask 138240   ;;  %v176_v0 = vlaneseq  ;;  %v664_v1 = vmov 0.0   ;;  %s792_s13 = smov (!%p161_p3, %s515_s13), 1  ;;  %vm274_vm7 = vcmask 908288  }
   0xc   : > { %175 = vst.msk [vmem:[#allocation2 + $0x18] sm:$0xff] %vm174_vm0, %v664_v1  ;;  %s528_s14 = sshll.u32 %s792_s13, 3  ;;  %vm303_vm8 = vcmask 777216   ;;  %vm312_vm9 = vcmask 769024   ;;  %vm293_vm10 = vcmask 785408   ;;  %vm283_vm11 = vcmask 900096  }
   0xd   : > { %172 = vst [vmem:[#allocation2 + $0x8] sm:$0xff] %v664_v1  ;;  %v177_v2 = vand.u32 127, %v176_v0  ;;  %s165_s17 = scalar_lea.vmem %s787_s0, %s528_s14  ;;  %vm267_vm12 = vcmask 916480   ;;  %vm243_vm13 = vcmask 1039360   ;;  %vm255_vm14 = vcmask 1031168   ;;  %s529_s4 = sshll.u32 %s792_s13, 4 }
   0xe   : > { %173 = vst [vmem:[#allocation2 + $0x10] sm:$0xff] %v664_v1  ;;  %v197_v5 = vld [vmem:[%s165_s17] sm:$0xff]  ;;  %vm412_vm15 = vcmask 588800   ;;  %s170_s7 = scalar_lea.vmem %s790_s3, %s529_s4 }
   0xf   : > { %v180_v3 = vadd.s32 384, %v177_v2  ;;  %199 = vst [vmem:[#allocation1] ss:$2 sm:$0xff] %v197_v5  ;;  %v178_v8 = vadd.s32 128, %v177_v2  ;;  %v179_v9 = vadd.s32 256, %v177_v2 }
  0x11   : > { %v184_v4 = vadd.s32 1, %v180_v3  ;;  %v182_v12 = vadd.s32 1, %v178_v8  ;;  %v183_v13 = vadd.s32 1, %v179_v9 }
  0x13   : > { %v209_v6 = vld [vmem:[#allocation2 + $0x18] sm:$0xff]  ;;  %v188_v7 = vand.u32 15, %v184_v4  ;;  %v186_v16 = vand.u32 15, %v182_v12  ;;  %v187_v17 = vand.u32 15, %v183_v13 }
  0x14   : > { %301 = vrot.lane.b32.xlu1 %v209_v6, %s665_s18 }
  0x15   : > { %vm196_vm1 = vcmp.ne.s32.totalorder %v188_v7, 1  ;;  %vm192_vm2 = vcmp.ne.s32.totalorder %v188_v7, 0  ;;  %vm194_vm3 = vcmp.ne.s32.totalorder %v186_v16, 1  ;;  %vm195_vm4 = vcmp.ne.s32.totalorder %v187_v17, 1 }
  0x16   : > { %v233_v10 = vsel %vm196_vm1, %v209_v6, 0.0  ;;  %v221_v11 = vsel %vm192_vm2, %v209_v6, 0.0  ;;  %v200_v14 = vld.sshfl [vmem:[#allocation1] sm:$0xff pattern:$0x75316420]  ;;  %vm191_vm5 = vcmp.ne.s32.totalorder %v187_v17, 0 }
  0x17   : > { %310 = vrot.lane.b32.xlu0 %v233_v10, %s666_s19  ;;  %291 = vrot.lane.b32.xlu2 %v221_v11, %s667_s20  ;;  %v201_v15 = vld.sshfl [vmem:[#allocation1 + $0x8] sm:$0xff pattern:$0x75316420]  ;;  %204 = vst [vmem:[#allocation2 + $0x8] sm:$0xf] %v200_v14  ;;  %vm190_vm6 = vcmp.ne.s32.totalorder %v186_v16, 0 }
  0x18   : > { %205 = vst [vmem:[#allocation2 + $0x10] sm:$0xf] %v201_v15 }
  0x1c   : > { %281 = vrot.lane.b32.xlu1 %v233_v10, %s668_s21 }
  0x1e   : > { %v207_v18 = vld [vmem:[#allocation2 + $0x8] sm:$0xff] }
  0x1f   : > { %v208_v19 = vld [vmem:[#allocation2 + $0x10] sm:$0xff]  ;;  %v231_v20 = vsel %vm194_vm3, %v207_v18, 0.0  ;;  %v219_v25 = vsel %vm190_vm6, %v207_v18, 0.0  ;;  %v584_v27 = vpack.i.bf16 %v207_v18, %v664_v1 }
  0x20   : > { %v549_v21 = vpack.i.bf16 %v208_v19, %v207_v18  ;;  %v232_v22 = vsel %vm195_vm4, %v208_v19, 0.0  ;;  %v711_v24 = vsel %vm191_vm5, %v208_v19, 0.0  ;;  %v579_v28 = vpack.i.bf16 %v231_v20, %v664_v1 }
  0x21   : > { %v559_v23 = vpack.i.bf16 %v232_v22, %v231_v20  ;;  %v564_v26 = vpack.i.bf16 %v711_v24, %v219_v25  ;;  %v716_v29 = vpack.i.bf16 %v219_v25, %v664_v1 }
  0x22   : > { %555 = vrot.lane.b32.xlu2 %v549_v21, %s669_s22 }
  0x23   : > { %560 = vrot.lane.b32.xlu0 %v559_v23, %s666_s19 }
  0x24   : > { %550 = vrot.lane.b32.xlu1 %v549_v21, %s665_s18 }
  0x2a   : > { %565 = vrot.lane.b32.xlu2 %v564_v26, %s667_s20 }
  0x2b   : > { %570 = vrot.lane.b32.xlu0 %v559_v23, %s668_s21 }
  0x2c   : > { %265 = vrot.lane.b32.xlu1 %v711_v24, %s670_s23 }
  0x32   : > { %580 = vrot.lane.b32.xlu2 %v579_v28, %s672_s25 }
  0x33   : > { %575 = vrot.lane.b32.xlu0 %v716_v29, %s670_s23 }
  0x34   : > { %585 = vrot.lane.b32.xlu1 %v584_v27, %s671_s24 }
  0x3a   : > { %241 = vrot.lane.b32.xlu2 %v208_v19, %s671_s24 }
  0x3b   : > { %253 = vrot.lane.b32.xlu0 %v232_v22, %s672_s25 }
  0x71   : > { %v719_v30 = vpop.permute.xlu2 %291 }
  0x7c   : > { %v721_v31 = vpop.permute.xlu2 %555 }
  0x7d   : > { %v558_v32 = vunpack.i.h.bf16 %v721_v31  ;;  %v557_v33 = vunpack.i.l.bf16 %v721_v31  ;;  %v316_v31 = vld [vmem:[%s789_s2] sm:$0xff] }
  0x7f   : > { %v275_v34 = vsel %vm274_vm7, %v557_v33, %v558_v32 }
  0x80   : > { %v594_v35 = vpack.i.bf16 %v275_v34, %v557_v33 }
  0x82   : > { %595 = vrot.lane.b32.xlu0 %v594_v35, %s673_s26  ;;  %v674_v35 = vmov 0  }
  0x83   : > { %654 = vset.pattern.permute.xlu2 %v674_v35  ;;  %655 = vset.pattern.permute.xlu0 %v674_v35 }
  0x84   : > { %v566_v47 = vpop.permute.xlu2 %565 }
  0x85   : > { %v567_v50 = vunpack.i.l.bf16 %v566_v47  ;;  %v568_v52 = vunpack.i.h.bf16 %v566_v47 }
  0x86   : > { %v302_v36 = vpop.permute.xlu1 %301 }
  0x87   : > { %v294_v53 = vsel %vm293_vm10, %v567_v50, %v568_v52  ;;  %v295_v19 = vsel %vm293_vm10, %v568_v52, %v719_v30 }
  0x88   : > { %v614_v58 = vpack.i.bf16 %v294_v53, %v567_v50 }
  0x89   : > { %v311_v38 = vpop.permute.xlu0 %310 }
  0x8c   : > { %v581_v62 = vpop.permute.xlu2 %580 }
  0x8d   : > { %v583_v4 = vunpack.i.h.bf16 %v581_v62  ;;  %v582_v5 = vunpack.i.l.bf16 %v581_v62 }
  0x8e   : > { %v282_v37 = vpop.permute.xlu1 %281 }
  0x8f   : > { %v256_v10 = vsel %vm255_vm14, %v582_v5, %v583_v4 }
  0x94   : > { %v242_v8 = vpop.permute.xlu2 %241 }
  0x95   : > { %v561_v42 = vpop.permute.xlu0 %560 }
  0x96   : > { %v551_v39 = vpop.permute.xlu1 %550  ;;  %v563_v43 = vunpack.i.h.bf16 %v561_v42  ;;  %v562_v44 = vunpack.i.l.bf16 %v561_v42 }
  0x97   : > { %v553_v40 = vunpack.i.h.bf16 %v551_v39  ;;  %v552_v41 = vunpack.i.l.bf16 %v551_v39 }
  0x98   : > { %v313_v48 = vsel %vm312_vm9, %v562_v44, %v563_v43  ;;  %v314_v17 = vsel %vm312_vm9, %v563_v43, %v311_v38 }
  0x99   : > { %v304_v45 = vsel %vm303_vm8, %v552_v41, %v553_v40  ;;  %v305_v46 = vsel %vm303_vm8, %v553_v40, %v302_v36  ;;  %v604_v51 = vpack.i.bf16 %v313_v48, %v562_v44  ;;  %v609_v18 = vpack.i.bf16 %v552_v41, %v314_v17 }
  0x9a   : > { %v589_v49 = vpack.i.bf16 %v305_v46, %v304_v45 }
  0x9b   : > { %605 = vrot.lane.b32.xlu0 %v604_v51, %s673_s26 }
  0x9c   : > { %590 = vrot.lane.b32.xlu2 %v589_v49, %s673_s26 }
  0x9d   : > { %v571_v55 = vpop.permute.xlu0 %570 }
  0x9e   : > { %v266_v54 = vpop.permute.xlu1 %265  ;;  %v573_v56 = vunpack.i.h.bf16 %v571_v55  ;;  %v572_v57 = vunpack.i.l.bf16 %v571_v55 }
  0xa0   : > { %v284_v59 = vsel %vm283_vm11, %v572_v57, %v573_v56  ;;  %v285_v60 = vsel %vm283_vm11, %v573_v56, %v282_v37  ;;  %v619_v20 = vpack.i.bf16 %v572_v57, %v295_v19 }
  0xa1   : > { %v624_v61 = vpack.i.bf16 %v285_v60, %v284_v59 }
  0xa3   : > { %615 = vrot.lane.b32.xlu0 %v614_v58, %s673_s26 }
  0xa4   : > { %625 = vrot.lane.b32.xlu2 %v624_v61, %s673_s26 }
  0xa5   : > { %v576_v0 = vpop.permute.xlu0 %575 }
  0xa6   : > { %v586_v63 = vpop.permute.xlu1 %585  ;;  %v578_v1 = vunpack.i.h.bf16 %v576_v0  ;;  %v577_v21 = vunpack.i.l.bf16 %v576_v0 }
  0xa7   : > { %v588_v2 = vunpack.i.h.bf16 %v586_v63  ;;  %v587_v3 = vunpack.i.l.bf16 %v586_v63 }
  0xa8   : > { %v269_v6 = vsel %vm267_vm12, %v578_v1, %v266_v54  ;;  %v268_v22 = vsel %vm267_vm12, %v577_v21, %v578_v1 }
  0xa9   : > { %v634_v7 = vpack.i.bf16 %v266_v54, %v269_v6  ;;  %v244_v9 = vsel %vm243_vm13, %v587_v3, %v588_v2  ;;  %v245_v12 = vsel %vm243_vm13, %v588_v2, %v242_v8  ;;  %v629_v23 = vpack.i.bf16 %v268_v22, %v558_v32 }
  0xaa   : > { %v639_v16 = vpack.i.bf16 %v242_v8, %v245_v12 }
  0xac   : > { %635 = vrot.lane.b32.xlu2 %v634_v7, %s673_s26 }
  0xad   : > { %v254_v11 = vpop.permute.xlu0 %253 }
  0xae   : > { %v599_v13 = vpack.i.bf16 %v244_v9, %v254_v11  ;;  %v257_v14 = vsel %vm255_vm14, %v583_v4, %v254_v11 }
  0xaf   : > { %v644_v15 = vpack.i.bf16 %v257_v14, %v256_v10 }
  0xb0   : > { %600 = vrot.lane.b32.xlu1 %v599_v13, %s673_s26 }
  0xb1   : > { %645 = vrot.lane.b32.xlu0 %v644_v15, %s673_s26 }
  0xb4   : > { %640 = vrot.lane.b32.xlu2 %v639_v16, %s673_s26 }
  0xb8   : > { %610 = vrot.lane.b32.xlu1 %v609_v18, %s673_s26  ;;  %v315_v18 = vld [vmem:[%s788_s1] sm:$0xff] }
  0xb9   : > { %650 = vrot.lane.b32.xlu0 %v716_v29, %s673_s26 }
  0xbc   : > { %319 = vperm.xlu2 %654, %v316_v31  }
  0xc0   : > { %620 = vrot.lane.b32.xlu1 %v619_v20, %s673_s26 }
  0xc8   : > { %630 = vrot.lane.b32.xlu1 %v629_v23, %s673_s26 }
  0xd0   : > { %326 = vrot.lane.b32.xlu1 %v711_v24, %s673_s26 }
  0xf4   : > { %v596_v25 = vpop.permute.xlu0 %595 }
  0xf5   : > { %v598_v47 = vunpack.i.h.bf16 %v596_v25  ;;  %v597_v48 = vunpack.i.l.bf16 %v596_v25 }
  0xf6   : > { %v591_v30 = vpop.permute.xlu2 %590 }
  0xf7   : > { %v593_v38 = vunpack.i.h.bf16 %v591_v30  ;;  %v592_v39 = vunpack.i.l.bf16 %v591_v30  ;;  %v384_v57 = vsel %vm174_vm0, %v597_v48, %v598_v47 }
  0xf9   : > { %v391_v45 = vsel %vm174_vm0, %v592_v39, %v593_v38 }
  0xfe   : > { %v626_v34 = vpop.permute.xlu2 %625 }
  0xff   : > { %v628_v51 = vunpack.i.h.bf16 %v626_v34  ;;  %v627_v52 = vunpack.i.l.bf16 %v626_v34 }
 0x101   : > { %v387_v58 = vsel %vm174_vm0, %v627_v52, %v628_v51 }
 0x106   : > { %v636_v46 = vpop.permute.xlu2 %635 }
 0x107   : > { %v638_v59 = vunpack.i.h.bf16 %v636_v46  ;;  %v637_v60 = vunpack.i.l.bf16 %v636_v46 }
 0x109   : > { %v383_v13 = vsel %vm174_vm0, %v637_v60, %v638_v59 }
 0x10d   : > { %v606_v26 = vpop.permute.xlu0 %605 }
 0x10e   : > { %v608_v27 = vunpack.i.h.bf16 %v606_v26  ;;  %v607_v28 = vunpack.i.l.bf16 %v606_v26  ;;  %v641_v3 = vpop.permute.xlu2 %640 }
 0x10f   : > { %v643_v10 = vunpack.i.h.bf16 %v641_v3  ;;  %v642_v11 = vunpack.i.l.bf16 %v641_v3 }
 0x110   : > { %v392_v29 = vsel %vm174_vm0, %v607_v28, %v608_v27 }
 0x111   : > { %423 = vmatpush.msra.mxu0 %v392_v29  ;;  %v379_v19 = vsel %vm174_vm0, %v642_v11, %v643_v10 }
 0x115   : > { %v616_v32 = vpop.permute.xlu0 %615 }
 0x116   : > { %v618_v24 = vunpack.i.h.bf16 %v616_v32  ;;  %v617_v36 = vunpack.i.l.bf16 %v616_v32  ;;  %v320_v21 = vpop.permute.xlu2 %319 }
 0x118   : > { %v388_v44 = vsel %vm174_vm0, %v617_v36, %v618_v24 }
 0x122   : > { %v753_v33 = vpop.permute.xlu1 %600 }
 0x123   : > { %v646_v49 = vpop.permute.xlu0 %645  ;;  %v603_v4 = vunpack.i.h.bf16 %v753_v33  ;;  %v602_v5 = vunpack.i.l.bf16 %v753_v33 }
 0x124   : > { %v648_v63 = vunpack.i.h.bf16 %v646_v49  ;;  %v647_v0 = vunpack.i.l.bf16 %v646_v49 }
 0x125   : > { %v378_v14 = vsel %vm174_vm0, %v603_v4, %v642_v11 }
 0x126   : > { %v380_v12 = vsel %vm174_vm0, %v647_v0, %v648_v63  ;;  %v381_v15 = vsel %vm174_vm0, %v648_v63, %v602_v5 }
 0x12a   : > { %v611_v37 = vpop.permute.xlu1 %610 }
 0x12b   : > { %v613_v40 = vunpack.i.h.bf16 %v611_v37  ;;  %v612_v41 = vunpack.i.l.bf16 %v611_v37  ;;  %v651_v62 = vpop.permute.xlu0 %650 }
 0x12c   : > { %v653_v8 = vunpack.i.h.bf16 %v651_v62  ;;  %v652_v9 = vunpack.i.l.bf16 %v651_v62 }
 0x12d   : > { %v390_v42 = vsel %vm174_vm0, %v613_v40, %v592_v39  ;;  %v393_v43 = vsel %vm174_vm0, %v608_v27, %v612_v41 }
 0x12e   : > { %424 = vmatpush.msra.mxu0 %v390_v42  ;;  %443 = vmatpush.msra.mxu1 %v393_v43  ;;  %v376_v16 = vsel %vm174_vm0, %v652_v9, %v653_v8 }
 0x130   : > { %444 = vmatpush.msra.mxu1 %v391_v45  ;;  %425 = vmatpush.msra.mxu0 %v388_v44 }
 0x132   : > { %v621_v50 = vpop.permute.xlu1 %620 }
 0x133   : > { %v623_v53 = vunpack.i.h.bf16 %v621_v50  ;;  %v622_v54 = vunpack.i.l.bf16 %v621_v50 }
 0x135   : > { %v386_v55 = vsel %vm174_vm0, %v623_v53, %v627_v52  ;;  %v389_v56 = vsel %vm174_vm0, %v618_v24, %v622_v54 }
 0x136   : > { %426 = vmatpush.msra.mxu0 %v386_v55  ;;  %445 = vmatpush.msra.mxu1 %v389_v56 }
 0x138   : > { %427 = vmatpush.msra.mxu0 %v384_v57  ;;  %446 = vmatpush.msra.mxu1 %v387_v58 }
 0x13a   : > { %v631_v61 = vpop.permute.xlu1 %630 }
 0x13b   : > { %v633_v1 = vunpack.i.h.bf16 %v631_v61  ;;  %v632_v2 = vunpack.i.l.bf16 %v631_v61 }
 0x13d   : > { %v382_v6 = vsel %vm174_vm0, %v633_v1, %v637_v60  ;;  %v385_v7 = vsel %vm174_vm0, %v598_v47, %v632_v2 }
 0x13e   : > { %428 = vmatpush.msra.mxu0 %v382_v6  ;;  %447 = vmatpush.msra.mxu1 %v385_v7 }
 0x140   : > { %429 = vmatpush.msra.mxu0 %v380_v12  ;;  %448 = vmatpush.msra.mxu1 %v383_v13 }
 0x142   : > { %430 = vmatpush.msra.mxu0 %v378_v14  ;;  %449 = vmatpush.msra.mxu1 %v381_v15  ;;  %v327_v17 = vpop.permute.xlu1 %326 }
 0x143   : > { %v377_v20 = vsel %vm174_vm0, %v653_v8, %v327_v17 }
 0x144   : > { %450 = vmatpush.msra.mxu1 %v379_v19  ;;  %431 = vmatpush.msra.mxu0 %v376_v16 }
 0x145   : > { %524 = vmatmul.msk.f32.vlgmr.msra.gmra.mxu0 %vm412_vm15, %v315_v18 }
 0x146   : > { %451 = vmatpush.msra.mxu1 %v377_v20 }
 0x147   : > { %525 = vmatmul.msk.f32.vlgmr.msra.gmra.mxu1 %vm412_vm15, %v315_v18 }
 0x1c2   : > { %v433_v22 = vpop.f32.mrf.mxu0 }
 0x1c3   : > { %v434_v23 = vadd.f32 %v433_v22, %v320_v21 }
 0x1c4   : > { %v453_v25 = vpop.f32.mrf.mxu1 }
 0x1c5   : > { %v456_v26 = vmax.f32 %v434_v23, 0.0  ;;  %v454_v27 = vadd.f32 %v453_v25, %v320_v21 }
 0x1c7   : > { %458 = vst [vmem:[%s170_s7] sm:$0xff] %v456_v26  ;;  %v457_v28 = vmax.f32 %v454_v27, 0.0 }
 0x1c9   : > { %459 = vst [vmem:[%s170_s7 + $0x8] sm:$0xff] %v457_v28 }
 0x1ca PF: > { %s13_s12 = sadd.s32 1, %s662_s12  }
 0x1cb   : > { %p10_p4 = scmp.ge.s32.totalorder %s13_s12, 4  }
 0x1cd   :  { %12 = sbr.rel (!%p10_p4) target bundleno = 1 (0x1), region = 62 }

</bundles_post_ra>
